<compile_context>
chip_gen: v6e
topology: v6e:2x2x1
jax: 0.10.0
libtpu: 0.0.40
codegen_flags: <defaults>
</compile_context>

<pallas_src>
import functools

import jax
import jax.numpy as jnp
from jax import lax
from jax.experimental import pallas as pl
from jax.experimental.pallas import tpu as pltpu


_LANES = 128
_SUBLANES = 8


def _vfae_partials_kernel(y_ref, ydec_ref, x_ref, xdec_ref, mu_ref, lv_ref,
                          out_ref, acc_sup, acc_rec, acc_kl, *, tile_axis):
    j = pl.program_id(tile_axis)

    @pl.when(j == 0)
    def _init():
        acc_sup[...] = jnp.zeros_like(acc_sup)
        acc_rec[...] = jnp.zeros_like(acc_rec)
        acc_kl[...] = jnp.zeros_like(acc_kl)

    def bce_row_sum(t_ref, p_ref):
        # Elementwise BCE with PyTorch's log clamp, reduced over rows -> (1, 128).
        t = t_ref[...].astype(jnp.float32)
        p = p_ref[...].astype(jnp.float32)
        log_p = jnp.maximum(jnp.log(p), -100.0)
        log_1mp = jnp.maximum(jnp.log(1.0 - p), -100.0)
        elem = -(t * log_p + (1.0 - t) * log_1mp)
        return jnp.sum(elem, axis=0, keepdims=True)

    # ---- supervised BCE (flattened y stream, lane+sublane dense) ----
    acc_sup[...] += bce_row_sum(y_ref, ydec_ref)

    # ---- reconstruction BCE, sum reduction (flattened x stream) ----
    acc_rec[...] += bce_row_sum(x_ref, xdec_ref)

    # ---- KL(q(z1|x) || N(0, I)) element terms (flattened z stream) ----
    mu = mu_ref[...].astype(jnp.float32)
    lv = lv_ref[...].astype(jnp.float32)
    kl_elem = -lv - 1.0 + jnp.exp(lv) + mu * mu     # 0.5 factor applied in wrapper
    acc_kl[...] += jnp.sum(kl_elem, axis=0, keepdims=True)

    # ---- finalize: write this core's lane-dense (1, 3, 128) partials block ----
    @pl.when(j == pl.num_programs(tile_axis) - 1)
    def _fin():
        row = lax.broadcasted_iota(jnp.int32, (3, _LANES), 0)
        vals = jnp.where(row == 0, acc_sup[...],
               jnp.where(row == 1, acc_rec[...], acc_kl[...]))
        out_ref[...] = jnp.reshape(vals, (1, 3, _LANES))


def _round_up(a, b):
    return ((a + b - 1) // b) * b


def _num_tensorcores():
    """2 TensorCores per chip on v7x; 1 on v5e/v6e. Defaults to 1 if unknown."""
    try:
        kind = jax.devices()[0].device_kind.lower().replace(" ", "")
    except Exception:
        return 1
    return 2 if ("v7" in kind or "7x" in kind) else 1


def _vmem_capacity_bytes():
    try:
        info = pltpu.get_tpu_info()
        cap = int(getattr(info, "vmem_capacity_bytes", 0))
        if cap > 0:
            return cap
    except Exception:
        pass
    return 64 * 1024 * 1024   # conservative (v7x per-TensorCore VMEM)


def _pack_stream(arr, rows, pad_value):
    """Flatten to a (rows, 128) lane/sublane-dense stream, padding the tail with a
    neutral value whose loss contribution is exactly zero."""
    flat = jnp.reshape(arr, (-1,))
    pad = rows * _LANES - flat.shape[0]
    if pad:
        flat = jnp.concatenate(
            [flat, jnp.full((pad,), pad_value, dtype=flat.dtype)])
    return jnp.reshape(flat, (rows, _LANES))


def vfae_loss(y_pred, y_true, alpha=1.0, *, target_step_bytes=2 * 1024 * 1024,
              num_cores=None):
    """JAX/Pallas implementation of VFAELoss.forward (beta=0 path)."""
    x = y_true["x"]
    y = y_true["y"]
    _ = y_true["s"]   # torch.cat([x, s], -1) result is unused by the reference loss

    ydec = y_pred["y_decoded"]
    xdec = y_pred["x_decoded"]
    mu = y_pred["z1_enc_mu"]
    logvar = y_pred["z1_enc_logvar"]

    n = y.shape[0]                       # len(y) in the reference
    t_y = int(ydec.size)                 # BCELoss mean denominator
    t_x = int(x.size)
    t_z = int(mu.size)

    ncores = _num_tensorcores() if num_cores is None else int(num_cores)
    ncores = max(1, ncores)
    vmem_cap = _vmem_capacity_bytes()

    # ---- byte-based tile sizing: ~target_step_bytes of input blocks per grid step,
    #      tile count forced to a multiple of the TensorCore count (balanced split).
    total_bytes = sum(int(a.size) * a.dtype.itemsize
                      for a in (y, ydec, x, xdec, mu, logvar))
    g = max(ncores, pl.cdiv(total_bytes, int(target_step_bytes)))
    g = _round_up(g, ncores)
    g2 = g // ncores

    def tiles_for(num_elems):
        rows = pl.cdiv(num_elems, _LANES)
        tile_rows = _round_up(pl.cdiv(rows, g), _SUBLANES)   # (8,128)-aligned blocks
        return tile_rows, g * tile_rows

    tr_y, rows_y = tiles_for(t_y)
    tr_x, rows_x = tiles_for(t_x)
    tr_z, rows_z = tiles_for(t_z)

    # Neutral pads: BCE(target=1, pred=1) == 0 (with the -100 clamp), KL(0, 0) == 0.
    y_p = _pack_stream(y, rows_y, 1.0)
    ydec_p = _pack_stream(ydec, rows_y, 1.0)
    x_p = _pack_stream(x, rows_x, 1.0)
    xdec_p = _pack_stream(xdec, rows_x, 1.0)
    mu_p = _pack_stream(mu, rows_z, 0.0)
    lv_p = _pack_stream(logvar, rows_z, 0.0)

    step_bytes = _LANES * (tr_y * (y_p.dtype.itemsize + ydec_p.dtype.itemsize)
                           + tr_x * (x_p.dtype.itemsize + xdec_p.dtype.itemsize)
                           + tr_z * (mu_p.dtype.itemsize + lv_p.dtype.itemsize))
    vmem_limit = int(min(0.7 * vmem_cap,
                         max(16 * 1024 * 1024, 4 * step_bytes + (1 << 20))))

    if ncores > 1:
        grid = (ncores, g2)
        semantics = ("parallel", "arbitrary")
        tile_axis = 1
        in_map = lambda c, j: (c * g2 + j, 0)
        out_map = lambda c, j: (c, 0, 0)
    else:
        grid = (g,)
        semantics = ("arbitrary",)
        tile_axis = 0
        in_map = lambda j: (j, 0)
        out_map = lambda j: (0, 0, 0)

    kernel = functools.partial(_vfae_partials_kernel, tile_axis=tile_axis)

    cost = pl.CostEstimate(
        flops=int(7 * (t_x + t_y + t_z)),
        transcendentals=int(2 * (t_x + t_y) + t_z),
        bytes_accessed=int(total_bytes + ncores * 3 * _LANES * 4),
    )

    partials = pl.pallas_call(
        kernel,
        out_shape=jax.ShapeDtypeStruct((ncores, 3, _LANES), jnp.float32),
        grid=grid,
        in_specs=[
            pl.BlockSpec((tr_y, _LANES), in_map),      # y (flattened stream)
            pl.BlockSpec((tr_y, _LANES), in_map),      # y_decoded
            pl.BlockSpec((tr_x, _LANES), in_map),      # x
            pl.BlockSpec((tr_x, _LANES), in_map),      # x_decoded
            pl.BlockSpec((tr_z, _LANES), in_map),      # z1_enc_mu
            pl.BlockSpec((tr_z, _LANES), in_map),      # z1_enc_logvar
        ],
        out_specs=pl.BlockSpec((1, 3, _LANES), out_map),
        scratch_shapes=[
            pltpu.VMEM((1, _LANES), jnp.float32),      # supervised-BCE accumulator
            pltpu.VMEM((1, _LANES), jnp.float32),      # recon-BCE accumulator
            pltpu.VMEM((1, _LANES), jnp.float32),      # KL accumulator
        ],
        compiler_params=pltpu.CompilerParams(
            dimension_semantics=semantics,
            vmem_limit_bytes=vmem_limit,
        ),
        cost_estimate=cost,
    )(y_p, ydec_p, x_p, xdec_p, mu_p, lv_p)

    # Final scalar combine on 3*ncores*128 floats (negligible).
    sup_sum = jnp.sum(partials[:, 0, :])
    rec_sum = jnp.sum(partials[:, 1, :])
    kl_sum = jnp.sum(partials[:, 2, :])

    supervised_loss = sup_sum / float(t_y)     # BCELoss() mean over ALL elements
    kl_loss_z1 = 0.5 * kl_sum
    return 0.1 * (rec_sum + kl_loss_z1) / float(n) + alpha * supervised_loss


def _reference_loss(y_pred, y_true, alpha=1.0):
    """Pure-JAX reference mirroring the PyTorch module (for correctness checks)."""
    x = y_true["x"].astype(jnp.float32)
    y = y_true["y"].astype(jnp.float32)
    ydec = y_pred["y_decoded"].astype(jnp.float32)
    xdec = y_pred["x_decoded"].astype(jnp.float32)
    mu = y_pred["z1_enc_mu"].astype(jnp.float32)
    logvar = y_pred["z1_enc_logvar"].astype(jnp.float32)

    def bce(p, t):
        return -(t * jnp.maximum(jnp.log(p), -100.0)
                 + (1.0 - t) * jnp.maximum(jnp.log(1.0 - p), -100.0))

    supervised = jnp.mean(bce(ydec, y))
    recons = jnp.sum(bce(xdec, x))
    kl = 0.5 * jnp.sum(-logvar - 1.0 + jnp.exp(logvar) + mu * mu)
    return 0.1 * (recons + kl) / y.shape[0] + alpha * supervised


if __name__ == "__main__":
    def make_inputs(key, n, dx, ds, dy, dz):
        keys = jax.random.split(key, 7)
        x = jax.random.uniform(keys[0], (n, dx), jnp.float32, 0.05, 0.95)
        s = (jax.random.uniform(keys[1], (n, ds)) > 0.5).astype(jnp.float32)
        y = (jax.random.uniform(keys[2], (n, dy)) > 0.5).astype(jnp.float32)
        y_decoded = jax.nn.sigmoid(jax.random.normal(keys[3], (n, dy), jnp.float32))
        x_decoded = jax.nn.sigmoid(jax.random.normal(keys[4], (n, dx), jnp.float32))
        mu = jax.random.normal(keys[5], (n, dz), jnp.float32)
        logvar = 0.5 * jax.random.normal(keys[6], (n, dz), jnp.float32)
        y_pred = {"y_decoded": y_decoded, "x_decoded": x_decoded,
                  "z1_enc_mu": mu, "z1_enc_logvar": logvar}
        y_true = {"x": x, "s": s, "y": y}
        return y_pred, y_true

    key = jax.random.PRNGKey(0)
    k1, k2 = jax.random.split(key)

    # Small single-tile case (toy shapes consistent with the module).
    y_pred, y_true = make_inputs(k1, n=8, dx=16, ds=1, dy=1, dz=8)
    loss = jax.block_until_ready(vfae_loss(y_pred, y_true, alpha=1.0))
    ref = _reference_loss(y_pred, y_true, alpha=1.0)
    assert jnp.allclose(loss, ref, rtol=2e-5, atol=1e-5), (loss, ref)

    # Multi-tile case (small shapes; tiny target_step_bytes forces several tiles,
    # exercising accumulation across grid steps and the neutral tail padding).
    y_pred2, y_true2 = make_inputs(k2, n=300, dx=24, ds=1, dy=2, dz=10)
    loss2 = jax.block_until_ready(
        vfae_loss(y_pred2, y_true2, alpha=0.7, target_step_bytes=16384))
    ref2 = _reference_loss(y_pred2, y_true2, alpha=0.7)
    assert jnp.allclose(loss2, ref2, rtol=1e-4, atol=1e-4), (loss2, ref2)

    # Same data through the balanced 2-TensorCore code path (runs serialized but
    # correct on single-TC chips; used natively on v7x).
    loss3 = jax.block_until_ready(
        vfae_loss(y_pred2, y_true2, alpha=0.7, target_step_bytes=16384, num_cores=2))
    assert jnp.allclose(loss3, ref2, rtol=1e-4, atol=1e-4), (loss3, ref2)

    print("KERNEL_OK")
</pallas_src>

<mosaic_0001>
module attributes {stable_mosaic.version = 11 : i64} {
  func.func @_vfae_partials_kernel(%arg0: i32, %arg1: memref<8x128xf32, #tpu.memory_space<vmem>>, %arg2: memref<8x128xf32, #tpu.memory_space<vmem>>, %arg3: memref<8x128xf32, #tpu.memory_space<vmem>>, %arg4: memref<8x128xf32, #tpu.memory_space<vmem>>, %arg5: memref<8x128xf32, #tpu.memory_space<vmem>>, %arg6: memref<8x128xf32, #tpu.memory_space<vmem>>, %arg7: memref<1x3x128xf32, #tpu.memory_space<vmem>>, %arg8: memref<1x128xf32, #tpu.memory_space<vmem>>, %arg9: memref<1x128xf32, #tpu.memory_space<vmem>>, %arg10: memref<1x128xf32, #tpu.memory_space<vmem>>) attributes {dimension_semantics = [#tpu.dimension_semantics<arbitrary>], iteration_bounds = array<i64: 1>, scalar_prefetch = 0 : i64, scratch_operands = 3 : i64, tpu.core_type = #tpu.core_type<tc>, window_params = [{transform_indices = @transform_0, window_bounds = array<i64: 8, 128>}, {transform_indices = @transform_1, window_bounds = array<i64: 8, 128>}, {transform_indices = @transform_2, window_bounds = array<i64: 8, 128>}, {transform_indices = @transform_3, window_bounds = array<i64: 8, 128>}, {transform_indices = @transform_4, window_bounds = array<i64: 8, 128>}, {transform_indices = @transform_5, window_bounds = array<i64: 8, 128>}, {pipeline_mode = #tpu.pipeline_mode<synchronous>, transform_indices = @transform_6, window_bounds = array<i64: 1, 3, 128>}]} {
    %c0_i32 = arith.constant 0 : i32
    %0 = arith.cmpi eq, %arg0, %c0_i32 : i32
    %1 = arith.extui %0 : i1 to i32
    %c0_i32_0 = arith.constant 0 : i32
    %2 = arith.cmpi ne, %1, %c0_i32_0 : i32
    scf.if %2 {
      %cst_40 = arith.constant 0.000000e+00 : f32
      %65 = vector.broadcast %cst_40 : f32 to vector<1x128xf32>
      %c0_41 = arith.constant 0 : index
      %c0_42 = arith.constant 0 : index
      %66 = vector.load %arg8[%c0_41, %c0_42] : memref<1x128xf32, #tpu.memory_space<vmem>>, vector<1x128xf32>
      tpu.vector_store %arg8[%c0_41, %c0_42], %65 {strides = array<i32>} : memref<1x128xf32, #tpu.memory_space<vmem>>, vector<1x128xf32>,
      %cst_43 = arith.constant 0.000000e+00 : f32
      %67 = vector.broadcast %cst_43 : f32 to vector<1x128xf32>
      %c0_44 = arith.constant 0 : index
      %c0_45 = arith.constant 0 : index
      %68 = vector.load %arg9[%c0_44, %c0_45] : memref<1x128xf32, #tpu.memory_space<vmem>>, vector<1x128xf32>
      tpu.vector_store %arg9[%c0_44, %c0_45], %67 {strides = array<i32>} : memref<1x128xf32, #tpu.memory_space<vmem>>, vector<1x128xf32>,
      %cst_46 = arith.constant 0.000000e+00 : f32
      %69 = vector.broadcast %cst_46 : f32 to vector<1x128xf32>
      %c0_47 = arith.constant 0 : index
      %c0_48 = arith.constant 0 : index
      %70 = vector.load %arg10[%c0_47, %c0_48] : memref<1x128xf32, #tpu.memory_space<vmem>>, vector<1x128xf32>
      tpu.vector_store %arg10[%c0_47, %c0_48], %69 {strides = array<i32>} : memref<1x128xf32, #tpu.memory_space<vmem>>, vector<1x128xf32>,
    } else {
    }
    %c0 = arith.constant 0 : index
    %c0_1 = arith.constant 0 : index
    %3 = vector.load %arg8[%c0, %c0_1] : memref<1x128xf32, #tpu.memory_space<vmem>>, vector<1x128xf32>
    %c0_2 = arith.constant 0 : index
    %c0_3 = arith.constant 0 : index
    %4 = vector.load %arg1[%c0_2, %c0_3] : memref<8x128xf32, #tpu.memory_space<vmem>>, vector<8x128xf32>
    %c0_4 = arith.constant 0 : index
    %c0_5 = arith.constant 0 : index
    %5 = vector.load %arg2[%c0_4, %c0_5] : memref<8x128xf32, #tpu.memory_space<vmem>>, vector<8x128xf32>
    %6 = math.log %5 : vector<8x128xf32>
    %cst = arith.constant -1.000000e+02 : f32
    %7 = vector.broadcast %cst : f32 to vector<8x128xf32>
    %8 = arith.maximumf %6, %7 : vector<8x128xf32>
    %cst_6 = arith.constant 1.000000e+00 : f32
    %9 = vector.broadcast %cst_6 : f32 to vector<8x128xf32>
    %10 = arith.subf %9, %5 : vector<8x128xf32>
    %11 = math.log %10 : vector<8x128xf32>
    %cst_7 = arith.constant -1.000000e+02 : f32
    %12 = vector.broadcast %cst_7 : f32 to vector<8x128xf32>
    %13 = arith.maximumf %11, %12 : vector<8x128xf32>
    %14 = arith.mulf %4, %8 : vector<8x128xf32>
    %cst_8 = arith.constant 1.000000e+00 : f32
    %15 = vector.broadcast %cst_8 : f32 to vector<8x128xf32>
    %16 = arith.subf %15, %4 : vector<8x128xf32>
    %17 = arith.mulf %16, %13 : vector<8x128xf32>
    %18 = arith.addf %14, %17 : vector<8x128xf32>
    %cst_9 = arith.constant 0.000000e+00 : f32
    %19 = vector.broadcast %cst_9 : f32 to vector<8x128xf32>
    %20 = arith.subf %19, %18 : vector<8x128xf32>
    %cst_10 = arith.constant dense<0.000000e+00> : vector<128xf32>
    %21 = vector.multi_reduction <add>, %20, %cst_10 [0] : vector<8x128xf32> to vector<128xf32>
    %22 = vector.shape_cast %21 : vector<128xf32> to vector<1x128xf32>
    %23 = arith.addf %3, %22 : vector<1x128xf32>
    %c0_11 = arith.constant 0 : index
    %c0_12 = arith.constant 0 : index
    %24 = vector.load %arg8[%c0_11, %c0_12] : memref<1x128xf32, #tpu.memory_space<vmem>>, vector<1x128xf32>
    tpu.vector_store %arg8[%c0_11, %c0_12], %23 {strides = array<i32>} : memref<1x128xf32, #tpu.memory_space<vmem>>, vector<1x128xf32>,
    %c0_13 = arith.constant 0 : index
    %c0_14 = arith.constant 0 : index
    %25 = vector.load %arg9[%c0_13, %c0_14] : memref<1x128xf32, #tpu.memory_space<vmem>>, vector<1x128xf32>
    %c0_15 = arith.constant 0 : index
    %c0_16 = arith.constant 0 : index
    %26 = vector.load %arg3[%c0_15, %c0_16] : memref<8x128xf32, #tpu.memory_space<vmem>>, vector<8x128xf32>
    %c0_17 = arith.constant 0 : index
    %c0_18 = arith.constant 0 : index
    %27 = vector.load %arg4[%c0_17, %c0_18] : memref<8x128xf32, #tpu.memory_space<vmem>>, vector<8x128xf32>
    %28 = math.log %27 : vector<8x128xf32>
    %cst_19 = arith.constant -1.000000e+02 : f32
    %29 = vector.broadcast %cst_19 : f32 to vector<8x128xf32>
    %30 = arith.maximumf %28, %29 : vector<8x128xf32>
    %cst_20 = arith.constant 1.000000e+00 : f32
    %31 = vector.broadcast %cst_20 : f32 to vector<8x128xf32>
    %32 = arith.subf %31, %27 : vector<8x128xf32>
    %33 = math.log %32 : vector<8x128xf32>
    %cst_21 = arith.constant -1.000000e+02 : f32
    %34 = vector.broadcast %cst_21 : f32 to vector<8x128xf32>
    %35 = arith.maximumf %33, %34 : vector<8x128xf32>
    %36 = arith.mulf %26, %30 : vector<8x128xf32>
    %cst_22 = arith.constant 1.000000e+00 : f32
    %37 = vector.broadcast %cst_22 : f32 to vector<8x128xf32>
    %38 = arith.subf %37, %26 : vector<8x128xf32>
    %39 = arith.mulf %38, %35 : vector<8x128xf32>
    %40 = arith.addf %36, %39 : vector<8x128xf32>
    %cst_23 = arith.constant 0.000000e+00 : f32
    %41 = vector.broadcast %cst_23 : f32 to vector<8x128xf32>
    %42 = arith.subf %41, %40 : vector<8x128xf32>
    %cst_24 = arith.constant dense<0.000000e+00> : vector<128xf32>
    %43 = vector.multi_reduction <add>, %42, %cst_24 [0] : vector<8x128xf32> to vector<128xf32>
    %44 = vector.shape_cast %43 : vector<128xf32> to vector<1x128xf32>
    %45 = arith.addf %25, %44 : vector<1x128xf32>
    %c0_25 = arith.constant 0 : index
    %c0_26 = arith.constant 0 : index
    %46 = vector.load %arg9[%c0_25, %c0_26] : memref<1x128xf32, #tpu.memory_space<vmem>>, vector<1x128xf32>
    tpu.vector_store %arg9[%c0_25, %c0_26], %45 {strides = array<i32>} : memref<1x128xf32, #tpu.memory_space<vmem>>, vector<1x128xf32>,
    %c0_27 = arith.constant 0 : index
    %c0_28 = arith.constant 0 : index
    %47 = vector.load %arg5[%c0_27, %c0_28] : memref<8x128xf32, #tpu.memory_space<vmem>>, vector<8x128xf32>
    %c0_29 = arith.constant 0 : index
    %c0_30 = arith.constant 0 : index
    %48 = vector.load %arg6[%c0_29, %c0_30] : memref<8x128xf32, #tpu.memory_space<vmem>>, vector<8x128xf32>
    %cst_31 = arith.constant 0.000000e+00 : f32
    %49 = vector.broadcast %cst_31 : f32 to vector<8x128xf32>
    %50 = arith.subf %49, %48 : vector<8x128xf32>
    %cst_32 = arith.constant 1.000000e+00 : f32
    %51 = vector.broadcast %cst_32 : f32 to vector<8x128xf32>
    %52 = arith.subf %50, %51 : vector<8x128xf32>
    %53 = math.exp %48 : vector<8x128xf32>
    %54 = arith.addf %52, %53 : vector<8x128xf32>
    %55 = arith.mulf %47, %47 : vector<8x128xf32>
    %56 = arith.addf %54, %55 : vector<8x128xf32>
    %c0_33 = arith.constant 0 : index
    %c0_34 = arith.constant 0 : index
    %57 = vector.load %arg10[%c0_33, %c0_34] : memref<1x128xf32, #tpu.memory_space<vmem>>, vector<1x128xf32>
    %cst_35 = arith.constant dense<0.000000e+00> : vector<128xf32>
    %58 = vector.multi_reduction <add>, %56, %cst_35 [0] : vector<8x128xf32> to vector<128xf32>
    %59 = vector.shape_cast %58 : vector<128xf32> to vector<1x128xf32>
    %60 = arith.addf %57, %59 : vector<1x128xf32>
    %c0_36 = arith.constant 0 : index
    %c0_37 = arith.constant 0 : index
    %61 = vector.load %arg10[%c0_36, %c0_37] : memref<1x128xf32, #tpu.memory_space<vmem>>, vector<1x128xf32>
    tpu.vector_store %arg10[%c0_36, %c0_37], %60 {strides = array<i32>} : memref<1x128xf32, #tpu.memory_space<vmem>>, vector<1x128xf32>,
    %c0_i32_38 = arith.constant 0 : i32
    %62 = arith.cmpi eq, %arg0, %c0_i32_38 : i32
    %63 = arith.extui %62 : i1 to i32
    %c0_i32_39 = arith.constant 0 : i32
    %64 = arith.cmpi ne, %63, %c0_i32_39 : i32
    scf.if %64 {
      %65 = tpu.iota {dimensions = array<i32: 0>} : vector<3x128xi32>
      %c0_i32_40 = arith.constant 0 : i32
      %66 = vector.broadcast %c0_i32_40 : i32 to vector<3x128xi32>
      %67 = arith.cmpi eq, %65, %66 : vector<3x128xi32>
      %c0_41 = arith.constant 0 : index
      %c0_42 = arith.constant 0 : index
      %68 = vector.load %arg8[%c0_41, %c0_42] : memref<1x128xf32, #tpu.memory_space<vmem>>, vector<1x128xf32>
      %c1_i32 = arith.constant 1 : i32
      %69 = vector.broadcast %c1_i32 : i32 to vector<3x128xi32>
      %70 = arith.cmpi eq, %65, %69 : vector<3x128xi32>
      %c0_43 = arith.constant 0 : index
      %c0_44 = arith.constant 0 : index
      %71 = vector.load %arg9[%c0_43, %c0_44] : memref<1x128xf32, #tpu.memory_space<vmem>>, vector<1x128xf32>
      %c0_45 = arith.constant 0 : index
      %c0_46 = arith.constant 0 : index
      %72 = vector.load %arg10[%c0_45, %c0_46] : memref<1x128xf32, #tpu.memory_space<vmem>>, vector<1x128xf32>
      %73 = vector.shape_cast %71 : vector<1x128xf32> to vector<1x128xf32>
      %74 = vector.broadcast %73 : vector<1x128xf32> to vector<3x128xf32>
      %75 = vector.shape_cast %72 : vector<1x128xf32> to vector<1x128xf32>
      %76 = vector.broadcast %75 : vector<1x128xf32> to vector<3x128xf32>
      %77 = arith.select %70, %74, %76 : vector<3x128xi1>, vector<3x128xf32>
      %78 = vector.shape_cast %68 : vector<1x128xf32> to vector<1x128xf32>
      %79 = vector.broadcast %78 : vector<1x128xf32> to vector<3x128xf32>
      %80 = arith.select %67, %79, %77 : vector<3x128xi1>, vector<3x128xf32>
      %81 = vector.shape_cast %80 : vector<3x128xf32> to vector<1x3x128xf32>
      %c0_47 = arith.constant 0 : index
      %c0_48 = arith.constant 0 : index
      %c0_49 = arith.constant 0 : index
      %82 = vector.load %arg7[%c0_47, %c0_48, %c0_49] : memref<1x3x128xf32, #tpu.memory_space<vmem>>, vector<1x3x128xf32>
      tpu.vector_store %arg7[%c0_47, %c0_48, %c0_49], %81 {strides = array<i32>} : memref<1x3x128xf32, #tpu.memory_space<vmem>>, vector<1x3x128xf32>,
    } else {
    }
    return
  }
  func.func @transform_0(%arg0: i32) -> (i32, i32) {
    %c0_i32 = arith.constant 0 : i32
    %c0_i32_0 = arith.constant 0 : i32
    return %arg0, %c0_i32 : i32, i32
  }
  func.func @transform_1(%arg0: i32) -> (i32, i32) {
    %c0_i32 = arith.constant 0 : i32
    %c0_i32_0 = arith.constant 0 : i32
    return %arg0, %c0_i32 : i32, i32
  }
  func.func @transform_2(%arg0: i32) -> (i32, i32) {
    %c0_i32 = arith.constant 0 : i32
    %c0_i32_0 = arith.constant 0 : i32
    return %arg0, %c0_i32 : i32, i32
  }
  func.func @transform_3(%arg0: i32) -> (i32, i32) {
    %c0_i32 = arith.constant 0 : i32
    %c0_i32_0 = arith.constant 0 : i32
    return %arg0, %c0_i32 : i32, i32
  }
  func.func @transform_4(%arg0: i32) -> (i32, i32) {
    %c0_i32 = arith.constant 0 : i32
    %c0_i32_0 = arith.constant 0 : i32
    return %arg0, %c0_i32 : i32, i32
  }
  func.func @transform_5(%arg0: i32) -> (i32, i32) {
    %c0_i32 = arith.constant 0 : i32
    %c0_i32_0 = arith.constant 0 : i32
    return %arg0, %c0_i32 : i32, i32
  }
  func.func @transform_6(%arg0: i32) -> (i32, i32, i32) {
    %c0_i32 = arith.constant 0 : i32
    %c0_i32_0 = arith.constant 0 : i32
    %c0_i32_1 = arith.constant 0 : i32
    %c0_i32_2 = arith.constant 0 : i32
    return %c0_i32, %c0_i32_0, %c0_i32_1 : i32, i32, i32
  }
}

</mosaic_0001>

<bundles_post_ra>
// kernel: tpu_custom_call.1
= control target key start
LH: loop header
LB: loop body
LE: loop exit
PB: predicated region body
PF: predicated region fallthrough
CT: control target
= control target key end

     0   :  { %11 = vsyncpa [#allocation6], 0  ;;  %s378_s0 = inlined_call_operand.hbm [shape: f32[8,128], index: 0, kind: input, shape index: {}]   ;;  %s379_s1 = inlined_call_operand.hbm [shape: f32[8,128], index: 1, kind: input, shape index: {}]   ;;  %s380_s2 = inlined_call_operand.hbm [shape: f32[8,128], index: 2, kind: input, shape index: {}]   ;;  %s381_s3 = inlined_call_operand.hbm [shape: f32[8,128], index: 3, kind: input, shape index: {}]   ;;  %s382_s4 = inlined_call_operand.hbm [shape: f32[8,128], index: 4, kind: input, shape index: {}]   ;;  %s383_s5 = inlined_call_operand.vmem [shape: f32[8,128], index: 5, kind: input, shape index: {}]   ;;  %s384_s6 = inlined_call_operand.vmem [shape: f32[1,3,128], index: 6, kind: output, shape index: {}]  }
   0x1   :  { %12 = vsyncpa [#allocation8], 0 }
   0x2   :  { %13 = vsyncpa [#allocation11], 0  ;;  %s316_s21 = smov [#allocation7]   ;;  %s317_s23 = smov [#allocation10]  }
   0x3   :  { %s30_s22 = sshll.u32 %s316_s21, 4  ;;  %s50_s24 = sshll.u32 %s317_s23, 4  ;;  %s31_s22 = int_to_ptr.vmem [resolvable:$true] %s30_s22  ;;  %s51_s24 = int_to_ptr.vmem [resolvable:$true] %s50_s24 }
   0x4   :  { %s218_s25 = scalar_lea.vmem %s31_s22, 128  ;;  %p223_p1 = scmp.lt.s32.totalorder %s31_s22, %s31_s22 }
   0x5   :  { %p219_p0 = scmp.ne.s32.totalorder %s31_s22, %s218_s25  ;;  %p224_p2 = scmp.lt.s32.totalorder %s218_s25, %s218_s25 }
   0x7   :  { %p225_p3 = por %p224_p2, %p223_p1 }
   0x9   :  { %p226_p4 = pnand %p225_p3, %p219_p0 }
   0xb   :  { %229 = shalt.err (!%p226_p4)
}
   0xc   :  { %33 = dma.hbm_to_vmem [thread:$0]  %s379_s1, 128, %s31_s22, [#allocation8]  }
   0xd   :  { %s238_s28 = scalar_lea.vmem %s51_s24, 128  ;;  %p243_p6 = scmp.lt.s32.totalorder %s51_s24, %s51_s24 }
   0xe   :  { %p239_p5 = scmp.ne.s32.totalorder %s51_s24, %s238_s28  ;;  %p244_p7 = scmp.lt.s32.totalorder %s238_s28, %s238_s28 }
  0x10   :  { %p245_p8 = por %p244_p7, %p243_p6 }
  0x12   :  { %p246_p9 = pnand %p245_p8, %p239_p5 }
  0x14   :  { %249 = shalt.err (!%p246_p9)
}
  0x15   :  { %53 = dma.hbm_to_vmem [thread:$0]  %s381_s3, 128, %s51_s24, [#allocation11]  }
  0x16   :  { %s318_s7 = smov [#allocation5]   ;;  %s319_s9 = smov [#allocation9]  }
  0x17   :  { %s20_s8 = sshll.u32 %s318_s7, 4  ;;  %s40_s10 = sshll.u32 %s319_s9, 4  ;;  %s21_s8 = int_to_ptr.vmem [resolvable:$true] %s20_s8  ;;  %s41_s10 = int_to_ptr.vmem [resolvable:$true] %s40_s10 }
  0x18   :  { %s258_s11 = scalar_lea.vmem %s21_s8, 128  ;;  %p263_p11 = scmp.lt.s32.totalorder %s21_s8, %s21_s8 }
  0x19   :  { %p259_p10 = scmp.ne.s32.totalorder %s21_s8, %s258_s11  ;;  %p264_p12 = scmp.lt.s32.totalorder %s258_s11, %s258_s11 }
  0x1b   :  { %p265_p13 = por %p264_p12, %p263_p11 }
  0x1d   :  { %p266_p0 = pnand %p265_p13, %p259_p10 }
  0x1f   :  { %269 = shalt.err (!%p266_p0)
}
  0x20   :  { %23 = dma.hbm_to_vmem [thread:$0]  %s378_s0, 128, %s21_s8, [#allocation6]  }
  0x21   :  { %s278_s13 = scalar_lea.vmem %s41_s10, 128  ;;  %p283_p2 = scmp.lt.s32.totalorder %s41_s10, %s41_s10 }
  0x22   :  { %p279_p1 = scmp.ne.s32.totalorder %s41_s10, %s278_s13  ;;  %p284_p3 = scmp.lt.s32.totalorder %s278_s13, %s278_s13 }
  0x24   :  { %p285_p4 = por %p284_p3, %p283_p2 }
  0x26   :  { %p286_p5 = pnand %p285_p4, %p279_p1 }
  0x28   :  { %289 = shalt.err (!%p286_p5)
}
  0x29   :  { %43 = dma.hbm_to_vmem [thread:$0]  %s380_s2, 128, %s41_s10, [#allocation8]  }
  0x2a   :  { %s320_s15 = smov [#allocation12]  }
  0x2b   :  { %s60_s16 = sshll.u32 %s320_s15, 4  ;;  %s61_s16 = int_to_ptr.vmem [resolvable:$true] %s60_s16 }
  0x2c   :  { %s298_s17 = scalar_lea.vmem %s61_s16, 128  ;;  %p303_p7 = scmp.lt.s32.totalorder %s61_s16, %s61_s16 }
  0x2d   :  { %p299_p6 = scmp.ne.s32.totalorder %s61_s16, %s298_s17  ;;  %p304_p8 = scmp.lt.s32.totalorder %s298_s17, %s298_s17 }
  0x2f   :  { %p305_p9 = por %p304_p8, %p303_p7 }
  0x31   :  { %p306_p10 = pnand %p305_p9, %p299_p6 }
  0x33   :  { %309 = shalt.err (!%p306_p10)
}
  0x34   :  { %63 = dma.hbm_to_vmem [thread:$0]  %s382_s4, 128, %s61_s16, [#allocation11]  }
  0x35   :  { %310 = dma.done.wait [#allocation6], 128  }
  0x36   :  { %311 = vsyncadd [#allocation6], 4294967168 }
  0x37   :  { %312 = dma.done.wait [#allocation8], 256  }
  0x38   :  { %313 = vsyncadd [#allocation8], 4294967040 }
  0x39   :  { %314 = dma.done.wait [#allocation11], 256  }
  0x3a   :  { %315 = vsyncadd [#allocation11], 4294967040  ;;  %v321_v0 = vmov 0.0   ;;  %v113_v1 = vld [vmem:[#allocation10] sm:$0xff]  ;;  %v90_v5 = vld [vmem:[#allocation7] sm:$0xff]  ;;  %v155_v58 = vlaneseq }
  0x3b   :  { %86 = vst [vmem:[#allocation3] sm:$0x1] %v321_v0  ;;  %85 = vst [vmem:[#allocation2] sm:$0x1] %v321_v0  ;;  %200 = vlog2.f32 %v113_v1  ;;  %v117_v2 = vsub.f32 1.0, %v113_v1  ;;  %v135_v3 = vld [vmem:[%s383_s5] sm:$0xff] }
  0x3c   :  { %87 = vst [vmem:[#allocation4] sm:$0x1] %v321_v0  ;;  %v138_v4 = vmul.f32 1.442695, %v135_v3  ;;  %v94_v6 = vsub.f32 1.0, %v90_v5  ;;  %v136_v7 = vsub.f32 0.0, %v135_v3 }
  0x3d   :  { %202 = vlog2.f32 %v117_v2  ;;  %v134_v8 = vld [vmem:[#allocation12] sm:$0xff]  ;;  %v112_v10 = vld [vmem:[#allocation9] sm:$0xff]  ;;  %v156_v63 = vshrl.u32 %v155_v58, 7 }
  0x3e   :  { %204 = vpow2.f32 %v138_v4  ;;  %v190_v11 = vadd.f32 -1.0, %v136_v7  ;;  %v141_v14 = vmul.f32 %v134_v8, %v134_v8  ;;  %v122_v18 = vsub.f32 1.0, %v112_v10  ;;  %v89_v19 = vld [vmem:[#allocation5] sm:$0xff] }
  0x3f   :  { %206 = vlog2.f32 %v90_v5  ;;  %v99_v28 = vsub.f32 1.0, %v89_v19  ;;  %vm159_vm0 = vcmp.eq.s32.totalorder %v156_v63, 1  ;;  %vm157_vm1 = vcmp.eq.s32.totalorder %v156_v63, 0 }
  0x40   :  { %208 = vlog2.f32 %v94_v6 }
  0x42   :  { %v111_v54 = vld [vmem:[#allocation3] sm:$0x1]  ;;  %v88_v60 = vld [vmem:[#allocation2] sm:$0x1] }
  0x43   :  { %v143_v47 = vld [vmem:[#allocation4] sm:$0x1] }
  0x48   :  { %v201_v9 = vpop.eup %200 }
  0x49   :  { %v115_v12 = vmul.f32 0.6931472, %v201_v9 }
  0x4a   :  { %v203_v13 = vpop.eup %202 }
  0x4b   :  { %v205_v15 = vpop.eup %204  ;;  %v116_v16 = vmax.f32 %v115_v12, -100.0  ;;  %v119_v17 = vmul.f32 0.6931472, %v203_v13 }
  0x4c   :  { %v207_v20 = vpop.eup %206  ;;  %v140_v21 = vadd.f32 %v205_v15, %v190_v11 }
  0x4d   :  { %v209_v22 = vpop.eup %208  ;;  %v120_v23 = vmax.f32 %v119_v17, -100.0  ;;  %v121_v24 = vmul.f32 %v116_v16, %v112_v10  ;;  %v92_v25 = vmul.f32 0.6931472, %v207_v20 }
  0x4e   :  { %v142_v26 = vadd.f32 %v141_v14, %v140_v21  ;;  %v96_v27 = vmul.f32 0.6931472, %v209_v22 }
  0x4f   :  { %v123_v29 = vmul.f32 %v122_v18, %v120_v23  ;;  %v93_v30 = vmax.f32 %v92_v25, -100.0 }
  0x50   :  { %v144_v31 = vrot.slane %v142_v26, 4  ;;  %v97_v32 = vmax.f32 %v96_v27, -100.0 }
  0x51   :  { %v124_v33 = vadd.f32 %v123_v29, %v121_v24  ;;  %v98_v34 = vmul.f32 %v93_v30, %v89_v19 }
  0x52   :  { %v145_v35 = vadd.f32 %v144_v31, %v142_v26  ;;  %v100_v36 = vmul.f32 %v99_v28, %v97_v32 }
  0x53   :  { %v125_v37 = vsub.f32 0.0, %v124_v33 }
  0x54   :  { %v146_v38 = vrot.slane %v145_v35, 2  ;;  %v101_v39 = vadd.f32 %v100_v36, %v98_v34 }
  0x55   :  { %v126_v40 = vrot.slane %v125_v37, 4 }
  0x56   :  { %v147_v41 = vadd.f32 %v146_v38, %v145_v35  ;;  %v102_v42 = vsub.f32 0.0, %v101_v39 }
  0x57   :  { %v127_v43 = vadd.f32 %v126_v40, %v125_v37 }
  0x58   :  { %v148_v44 = vrot.slane %v147_v41, 1  ;;  %v103_v45 = vrot.slane %v102_v42, 4 }
  0x59   :  { %v128_v46 = vrot.slane %v127_v43, 2 }
  0x5a   :  { %v149_v48 = vadd.f32 %v148_v44, %v147_v41  ;;  %v104_v49 = vadd.f32 %v103_v45, %v102_v42 }
  0x5b   :  { %v129_v50 = vadd.f32 %v128_v46, %v127_v43 }
  0x5c   :  { %v150_v51 = vadd.f32 %v149_v48, %v143_v47  ;;  %v105_v52 = vrot.slane %v104_v49, 2 }
  0x5d   :  { %v130_v53 = vrot.slane %v129_v50, 1 }
  0x5e   :  { %151 = vst [vmem:[#allocation4] sm:$0x1] %v150_v51  ;;  %v106_v55 = vadd.f32 %v105_v52, %v104_v49 }
  0x5f   :  { %v131_v56 = vadd.f32 %v130_v53, %v129_v50 }
  0x60   :  { %v107_v57 = vrot.slane %v106_v55, 1 }
  0x61   :  { %v132_v59 = vadd.f32 %v131_v56, %v111_v54 }
  0x62   :  { %v108_v61 = vadd.f32 %v107_v57, %v106_v55 }
  0x63   :  { %133 = vst [vmem:[#allocation3] sm:$0x1] %v132_v59 }
  0x64   :  { %v109_v62 = vadd.f32 %v108_v61, %v88_v60 }
  0x65   :  { %v192_v0 = vld [vmem:[#allocation4] ss:$0 sm:$0xff] }
  0x66   :  { %110 = vst [vmem:[#allocation2] sm:$0x1] %v109_v62 }
  0x6a   :  { %v191_v1 = vld [vmem:[#allocation3] ss:$0 sm:$0xff] }
  0x6b   :  { %v174_v2 = vsel %vm159_vm0, %v191_v1, %v192_v0 }
  0x6d   :  { %v193_v3 = vld [vmem:[#allocation2] ss:$0 sm:$0xff] }
  0x6e   :  { %v181_v4 = vsel %vm157_vm1, %v193_v3, %v174_v2 }
  0x6f   :  { %182 = vst [vmem:[%s384_s6] sm:$0x7] %v181_v4 }
  0x70   :  { %187 = vsyncpa [#allocation6], 1 }
  0x71   :  { %188 = vsyncpa [#allocation8], 1 }
  0x72   :  { %189 = vsyncpa [#allocation11], 1 }

</bundles_post_ra>
